<compile_context>
chip_gen: v6e
topology: v6e:2x2x1
jax: 0.10.0
libtpu: 0.0.40
codegen_flags: <defaults>
</compile_context>

<pallas_src>
import jax
import jax.numpy as jnp
from jax.experimental import pallas as pl
from jax.experimental.pallas import tpu as pltpu

TEXT_DIM = 768            # BERT hidden size (last_hidden_state[:, 0, :])
H1, H2, OUT = 256, 128, 3
OUT_PAD = 128             # lane-dense padded fc3 width


def _head_kernel(x_ref, w1_ref, b1_ref, w2_ref, b2_ref, w3_ref, b3_ref, o_ref):
    # In-kernel bf16 cast of the f32 activations (VPU; no extra HBM pass).
    x = x_ref[...].astype(jnp.bfloat16)
    # fc1 + ReLU   (bf16 operands, f32 MXU accumulation)
    h = jnp.dot(x, w1_ref[...], preferred_element_type=jnp.float32)
    h = jnp.maximum(h + b1_ref[...], 0.0)
    # fc2 + ReLU
    h = jnp.dot(h.astype(jnp.bfloat16), w2_ref[...],
                preferred_element_type=jnp.float32)
    h = jnp.maximum(h + b2_ref[...], 0.0)
    # fc3 (no activation), padded to 128 lanes -> unmasked, lane-dense store.
    o_ref[...] = (jnp.dot(h.astype(jnp.bfloat16), w3_ref[...],
                          preferred_element_type=jnp.float32)
                  + b3_ref[...]).astype(o_ref.dtype)


def _round_up(x, m):
    return (x + m - 1) // m * m


def _pick_bm(B, block_b):
    # Multiple of 16 rows (bf16 packs 16 rows per sublane group).
    bm = min(block_b, _round_up(B, 16))
    # Keep >= 2 grid steps once B is non-trivial so v7x's two TensorCores can
    # both take batch tiles via the "parallel" grid axis.
    if B >= 32:
        bm = min(bm, _round_up(pl.cdiv(B, 2), 16))
    return max(bm, 16)


def bert_text_head(cls_features, params, image=None, *, block_b=256):
    """cls_features: [B, 768] f32 (BERT CLS feature) -> logits [B, 3] f32.

    `image` is accepted to mirror bert_text.forward(input_ids, attention_mask, image)
    but is unused — the PyTorch module never touches it.
    """
    del image  # unused by the original module's forward
    w1, b1, w2, b2, w3, b3 = params

    # Guard: accept either padded (H2, 128) or raw (H2, 3) fc3 params.
    if w3.shape[1] != OUT_PAD:
        w3 = jnp.pad(w3, ((0, 0), (0, OUT_PAD - w3.shape[1])))
        b3 = jnp.pad(b3, ((0, 0), (0, OUT_PAD - b3.shape[1])))

    B = cls_features.shape[0]
    bm = _pick_bm(B, block_b)
    grid = (pl.cdiv(B, bm),)   # ragged batch handled by Pallas partial-block masking

    batch_spec = lambda shape: pl.BlockSpec(shape, lambda i: (i, 0))
    const_spec = lambda shape: pl.BlockSpec(shape, lambda i: (0, 0))

    flops = 2 * B * (TEXT_DIM * H1 + H1 * H2 + H2 * OUT_PAD)
    bytes_accessed = (B * TEXT_DIM * 4                       # f32 activations in
                      + (w1.size + w2.size + w3.size) * 2    # bf16 weights
                      + (b1.size + b2.size + b3.size) * 4    # f32 biases
                      + B * OUT_PAD * 4)                     # f32 lane-dense output

    out = pl.pallas_call(
        _head_kernel,
        out_shape=jax.ShapeDtypeStruct((B, OUT_PAD), jnp.float32),
        grid=grid,
        in_specs=[
            batch_spec((bm, TEXT_DIM)),     # x  (f32), tiled over batch
            const_spec((TEXT_DIM, H1)),     # W1 (bf16), DMA'd once
            const_spec((1, H1)),            # b1 (f32)
            const_spec((H1, H2)),           # W2 (bf16)
            const_spec((1, H2)),            # b2 (f32)
            const_spec((H2, OUT_PAD)),      # W3 (bf16, zero-padded to 128 cols)
            const_spec((1, OUT_PAD)),       # b3 (f32, zero-padded)
        ],
        out_specs=batch_spec((bm, OUT_PAD)),
        compiler_params=pltpu.CompilerParams(
            dimension_semantics=("parallel",),
            vmem_limit_bytes=16 << 20,
        ),
        cost_estimate=pl.CostEstimate(
            flops=flops, transcendentals=0, bytes_accessed=bytes_accessed),
    )(cls_features, w1, b1, w2, b2, w3, b3)

    return out[:, :OUT]


def init_params(key):
    """PyTorch nn.Linear default init (U(+-1/sqrt(fan_in))).

    Weights stored bf16 (fc3 zero-padded to 128 output columns); biases f32.
    """
    def linear(k, fan_in, fan_out, pad_to=None):
        kw, kb = jax.random.split(k)
        bound = 1.0 / jnp.sqrt(jnp.float32(fan_in))
        w = jax.random.uniform(kw, (fan_in, fan_out), jnp.float32, -bound, bound)
        b = jax.random.uniform(kb, (1, fan_out), jnp.float32, -bound, bound)
        if pad_to is not None and pad_to > fan_out:
            w = jnp.pad(w, ((0, 0), (0, pad_to - fan_out)))
            b = jnp.pad(b, ((0, 0), (0, pad_to - fan_out)))
        return w.astype(jnp.bfloat16), b
    k1, k2, k3 = jax.random.split(key, 3)
    w1, b1 = linear(k1, TEXT_DIM, H1)                 # fc1: 768 -> 256
    w2, b2 = linear(k2, H1, H2)                       # fc2: 256 -> 128
    w3, b3 = linear(k3, H2, OUT, pad_to=OUT_PAD)      # fc3: 128 -> 3 (padded to 128)
    return (w1, b1, w2, b2, w3, b3)


def reference(cls_features, params):
    """Pure-JAX reference at matching (bf16 operand / f32 accum) precision."""
    w1, b1, w2, b2, w3, b3 = params
    x = cls_features.astype(jnp.bfloat16)
    h = jax.nn.relu(jnp.dot(x, w1, preferred_element_type=jnp.float32) + b1)
    h = jax.nn.relu(jnp.dot(h.astype(jnp.bfloat16), w2,
                            preferred_element_type=jnp.float32) + b2)
    y = jnp.dot(h.astype(jnp.bfloat16), w3,
                preferred_element_type=jnp.float32) + b3
    return y[:, :OUT]


if __name__ == "__main__":
    key = jax.random.PRNGKey(0)
    kp, kt, ki = jax.random.split(key, 3)

    B = 8
    params = init_params(kp)
    # Stand-in for the BERT backbone output: last_hidden_state[:, 0, :] -> [B, 768].
    cls_features = jax.random.normal(kt, (B, TEXT_DIM), jnp.float32)
    # Dummy `image` to mirror forward(input_ids, attention_mask, image); unused.
    image = jax.random.normal(ki, (B, 3, 16, 16), jnp.float32)

    out = bert_text_head(cls_features, params, image)
    out = jax.block_until_ready(out)

    ref = reference(cls_features, params)
    assert out.shape == (B, OUT)
    assert jnp.allclose(out, ref, atol=2e-3, rtol=2e-3), \
        float(jnp.max(jnp.abs(out - ref)))
    print("KERNEL_OK")
</pallas_src>

<mosaic_0001>
module attributes {stable_mosaic.version = 11 : i64} {
  func.func @_head_kernel(%arg0: i32, %arg1: memref<16x768xf32, #tpu.memory_space<vmem>>, %arg2: memref<768x256xbf16, #tpu.memory_space<vmem>>, %arg3: memref<1x256xf32, #tpu.memory_space<vmem>>, %arg4: memref<256x128xbf16, #tpu.memory_space<vmem>>, %arg5: memref<1x128xf32, #tpu.memory_space<vmem>>, %arg6: memref<128x128xbf16, #tpu.memory_space<vmem>>, %arg7: memref<1x128xf32, #tpu.memory_space<vmem>>, %arg8: memref<16x128xf32, #tpu.memory_space<vmem>>) attributes {dimension_semantics = [#tpu.dimension_semantics<parallel>], iteration_bounds = array<i64: 1>, scalar_prefetch = 0 : i64, scratch_operands = 0 : i64, tpu.core_type = #tpu.core_type<tc>, window_params = [{transform_indices = @transform_0, window_bounds = array<i64: 16, 768>}, {pipeline_mode = #tpu.pipeline_mode<synchronous>, transform_indices = @transform_1, window_bounds = array<i64: 768, 256>}, {pipeline_mode = #tpu.pipeline_mode<synchronous>, transform_indices = @transform_2, window_bounds = array<i64: 1, 256>}, {pipeline_mode = #tpu.pipeline_mode<synchronous>, transform_indices = @transform_3, window_bounds = array<i64: 256, 128>}, {pipeline_mode = #tpu.pipeline_mode<synchronous>, transform_indices = @transform_4, window_bounds = array<i64: 1, 128>}, {pipeline_mode = #tpu.pipeline_mode<synchronous>, transform_indices = @transform_5, window_bounds = array<i64: 128, 128>}, {pipeline_mode = #tpu.pipeline_mode<synchronous>, transform_indices = @transform_6, window_bounds = array<i64: 1, 128>}, {transform_indices = @transform_7, window_bounds = array<i64: 16, 128>}]} {
    %c0 = arith.constant 0 : index
    %c0_0 = arith.constant 0 : index
    %0 = vector.load %arg1[%c0, %c0_0] : memref<16x768xf32, #tpu.memory_space<vmem>>, vector<16x768xf32>
    %1 = arith.truncf %0 : vector<16x768xf32> to vector<16x768xbf16>
    %c0_1 = arith.constant 0 : index
    %c0_2 = arith.constant 0 : index
    %2 = vector.load %arg2[%c0_1, %c0_2] : memref<768x256xbf16, #tpu.memory_space<vmem>>, vector<768x256xbf16>
    %cst = arith.constant dense<0.000000e+00> : vector<16x256xf32>
    %3 = tpu.matmul %1, %2, %cst {dimension_numbers = #tpu.dot_dimension_numbers<[1], [0], [0], [1], [0, 0, 1, 1], [], []>} : vector<16x768xbf16>, vector<768x256xbf16>, vector<16x256xf32> -> vector<16x256xf32>
    %c0_3 = arith.constant 0 : index
    %c0_4 = arith.constant 0 : index
    %4 = vector.load %arg3[%c0_3, %c0_4] : memref<1x256xf32, #tpu.memory_space<vmem>>, vector<1x256xf32>
    %5 = vector.broadcast %4 : vector<1x256xf32> to vector<16x256xf32>
    %6 = arith.addf %3, %5 : vector<16x256xf32>
    %cst_5 = arith.constant 0.000000e+00 : f32
    %7 = vector.broadcast %cst_5 : f32 to vector<16x256xf32>
    %8 = arith.maximumf %6, %7 : vector<16x256xf32>
    %9 = arith.truncf %8 : vector<16x256xf32> to vector<16x256xbf16>
    %c0_6 = arith.constant 0 : index
    %c0_7 = arith.constant 0 : index
    %10 = vector.load %arg4[%c0_6, %c0_7] : memref<256x128xbf16, #tpu.memory_space<vmem>>, vector<256x128xbf16>
    %cst_8 = arith.constant dense<0.000000e+00> : vector<16x128xf32>
    %11 = tpu.matmul %9, %10, %cst_8 {dimension_numbers = #tpu.dot_dimension_numbers<[1], [0], [0], [1], [0, 0, 1, 1], [], []>} : vector<16x256xbf16>, vector<256x128xbf16>, vector<16x128xf32> -> vector<16x128xf32>
    %c0_9 = arith.constant 0 : index
    %c0_10 = arith.constant 0 : index
    %12 = vector.load %arg5[%c0_9, %c0_10] : memref<1x128xf32, #tpu.memory_space<vmem>>, vector<1x128xf32>
    %13 = vector.broadcast %12 : vector<1x128xf32> to vector<16x128xf32>
    %14 = arith.addf %11, %13 : vector<16x128xf32>
    %cst_11 = arith.constant 0.000000e+00 : f32
    %15 = vector.broadcast %cst_11 : f32 to vector<16x128xf32>
    %16 = arith.maximumf %14, %15 : vector<16x128xf32>
    %17 = arith.truncf %16 : vector<16x128xf32> to vector<16x128xbf16>
    %c0_12 = arith.constant 0 : index
    %c0_13 = arith.constant 0 : index
    %18 = vector.load %arg6[%c0_12, %c0_13] : memref<128x128xbf16, #tpu.memory_space<vmem>>, vector<128x128xbf16>
    %cst_14 = arith.constant dense<0.000000e+00> : vector<16x128xf32>
    %19 = tpu.matmul %17, %18, %cst_14 {dimension_numbers = #tpu.dot_dimension_numbers<[1], [0], [0], [1], [0, 0, 1, 1], [], []>} : vector<16x128xbf16>, vector<128x128xbf16>, vector<16x128xf32> -> vector<16x128xf32>
    %c0_15 = arith.constant 0 : index
    %c0_16 = arith.constant 0 : index
    %20 = vector.load %arg7[%c0_15, %c0_16] : memref<1x128xf32, #tpu.memory_space<vmem>>, vector<1x128xf32>
    %21 = vector.broadcast %20 : vector<1x128xf32> to vector<16x128xf32>
    %22 = arith.addf %19, %21 : vector<16x128xf32>
    %c0_17 = arith.constant 0 : index
    %c0_18 = arith.constant 0 : index
    %23 = vector.load %arg8[%c0_17, %c0_18] : memref<16x128xf32, #tpu.memory_space<vmem>>, vector<16x128xf32>
    tpu.vector_store %arg8[%c0_17, %c0_18], %22 {strides = array<i32>} : memref<16x128xf32, #tpu.memory_space<vmem>>, vector<16x128xf32>,
    return
  }
  func.func @transform_0(%arg0: i32) -> (i32, i32) {
    %c0_i32 = arith.constant 0 : i32
    %c0_i32_0 = arith.constant 0 : i32
    return %arg0, %c0_i32 : i32, i32
  }
  func.func @transform_1(%arg0: i32) -> (i32, i32) {
    %c0_i32 = arith.constant 0 : i32
    %c0_i32_0 = arith.constant 0 : i32
    %c0_i32_1 = arith.constant 0 : i32
    return %c0_i32, %c0_i32_0 : i32, i32
  }
  func.func @transform_2(%arg0: i32) -> (i32, i32) {
    %c0_i32 = arith.constant 0 : i32
    %c0_i32_0 = arith.constant 0 : i32
    %c0_i32_1 = arith.constant 0 : i32
    return %c0_i32, %c0_i32_0 : i32, i32
  }
  func.func @transform_3(%arg0: i32) -> (i32, i32) {
    %c0_i32 = arith.constant 0 : i32
    %c0_i32_0 = arith.constant 0 : i32
    %c0_i32_1 = arith.constant 0 : i32
    return %c0_i32, %c0_i32_0 : i32, i32
  }
  func.func @transform_4(%arg0: i32) -> (i32, i32) {
    %c0_i32 = arith.constant 0 : i32
    %c0_i32_0 = arith.constant 0 : i32
    %c0_i32_1 = arith.constant 0 : i32
    return %c0_i32, %c0_i32_0 : i32, i32
  }
  func.func @transform_5(%arg0: i32) -> (i32, i32) {
    %c0_i32 = arith.constant 0 : i32
    %c0_i32_0 = arith.constant 0 : i32
    %c0_i32_1 = arith.constant 0 : i32
    return %c0_i32, %c0_i32_0 : i32, i32
  }
  func.func @transform_6(%arg0: i32) -> (i32, i32) {
    %c0_i32 = arith.constant 0 : i32
    %c0_i32_0 = arith.constant 0 : i32
    %c0_i32_1 = arith.constant 0 : i32
    return %c0_i32, %c0_i32_0 : i32, i32
  }
  func.func @transform_7(%arg0: i32) -> (i32, i32) {
    %c0_i32 = arith.constant 0 : i32
    %c0_i32_0 = arith.constant 0 : i32
    return %arg0, %c0_i32 : i32, i32
  }
}

</mosaic_0001>

<bundles_post_ra>
// kernel: tpu_custom_call.1
= control target key start
LH: loop header
LB: loop body
LE: loop exit
PB: predicated region body
PF: predicated region fallthrough
CT: control target
= control target key end

     0   :  { %12 = vsyncpa [#allocation3], 0  ;;  %s1690_s0 = inlined_call_operand.hbm [shape: f32[8,768], index: 0, kind: input, shape index: {}]   ;;  %s1691_s1 = inlined_call_operand.hbm [shape: bf16[768,256], index: 1, kind: input, shape index: {}]   ;;  %s1692_s2 = inlined_call_operand.vmem [shape: f32[1,256], index: 2, kind: input, shape index: {}]   ;;  %s1693_s3 = inlined_call_operand.hbm [shape: bf16[256,128], index: 3, kind: input, shape index: {}]   ;;  %s1694_s4 = inlined_call_operand.vmem [shape: f32[1,128], index: 4, kind: input, shape index: {}]   ;;  %s1695_s5 = inlined_call_operand.hbm [shape: bf16[128,128], index: 5, kind: input, shape index: {}]   ;;  %s1696_s6 = inlined_call_operand.vmem [shape: f32[1,128], index: 6, kind: input, shape index: {}]   ;;  %s1697_s7 = inlined_call_operand.hbm [shape: f32[8,128], index: 7, kind: output, shape index: {}]  }
   0x1   :  { %13 = vsyncpa [#allocation6], 0 }
   0x2   :  { %14 = vsyncpa [#allocation9], 0 }
   0x3   :  { %15 = vsyncpa [#allocation4], 0 }
   0x4   :  { %20 = vsyncadd [#allocation3], 768  ;;  %s1598_s24 = smov [#allocation5]  }
   0x5   :  { %s33_s25 = sshll.u32 %s1598_s24, 4  ;;  %s34_s25 = int_to_ptr.vmem [resolvable:$true] %s33_s25 }
   0x6   :  { %s1498_s26 = scalar_lea.vmem %s34_s25, 12288  ;;  %p1503_p1 = scmp.lt.s32.totalorder %s34_s25, %s34_s25 }
   0x7   :  { %p1499_p0 = scmp.ne.s32.totalorder %s34_s25, %s1498_s26  ;;  %p1504_p2 = scmp.lt.s32.totalorder %s1498_s26, %s1498_s26 }
   0x9   :  { %p1505_p3 = por %p1504_p2, %p1503_p1 }
   0xb   :  { %p1506_p4 = pnand %p1505_p3, %p1499_p0 }
   0xd   :  { %1509 = shalt.err (!%p1506_p4)
}
   0xe   :  { %s1599_s27 = smov 128   ;;  %s1600_s28 = smov 8  }
   0xf   :  { %39 = dma.hbm_to_vmem [thread:$0]  %s1691_s1, 12288, %s34_s25, [#allocation6], %s1599_s27, %s1599_s27, %s1600_s28  }
  0x10   :  { %s1601_s8 = smov [#allocation2]  }
  0x11   :  { %s21_s9 = sshll.u32 %s1601_s8, 4  ;;  %s22_s9 = int_to_ptr.vmem [resolvable:$true] %s21_s9 }
  0x12   :  { %s1518_s10 = scalar_lea.vmem %s22_s9, 768  ;;  %s1522_s11 = scalar_lea.vmem %s22_s9, 1536 }
  0x13   :  { %p1519_p5 = scmp.ne.s32.totalorder %s22_s9, %s1518_s10  ;;  %p1523_p6 = scmp.lt.s32.totalorder %s22_s9, %s22_s9 }
  0x14   :  { %p1524_p7 = scmp.lt.s32.totalorder %s1522_s11, %s1518_s10 }
  0x16   :  { %p1525_p8 = por %p1524_p7, %p1523_p6 }
  0x18   :  { %p1526_p9 = pnand %p1525_p8, %p1519_p5 }
  0x1a   :  { %1529 = shalt.err (!%p1526_p9)
}
  0x1b   :  { %s1602_s12 = smov 768   ;;  %s1603_s13 = smov 48  }
  0x1c   :  { %27 = dma.hbm_to_vmem [thread:$0]  %s1690_s0, 768, %s22_s9, [#allocation3], %s1602_s12, %s1602_s12, %s1603_s13  }
  0x1d   :  { %s1604_s16 = smov [#allocation7]  }
  0x1e   :  { %s47_s17 = sshll.u32 %s1604_s16, 4  ;;  %s48_s17 = int_to_ptr.vmem [resolvable:$true] %s47_s17 }
  0x1f   :  { %s1538_s1 = scalar_lea.vmem %s48_s17, 2048  ;;  %p1543_p11 = scmp.lt.s32.totalorder %s48_s17, %s48_s17 }
  0x20   :  { %p1539_p10 = scmp.ne.s32.totalorder %s48_s17, %s1538_s1  ;;  %p1544_p12 = scmp.lt.s32.totalorder %s1538_s1, %s1538_s1 }
  0x22   :  { %p1545_p13 = por %p1544_p12, %p1543_p11 }
  0x24   :  { %p1546_p0 = pnand %p1545_p13, %p1539_p10 }
  0x26   :  { %1549 = shalt.err (!%p1546_p0)
}
  0x27   :  { %s1605_s18 = smov 64   ;;  %s1606_s19 = smov 4  }
  0x28   :  { %53 = dma.hbm_to_vmem [thread:$0]  %s1693_s3, 2048, %s48_s17, [#allocation6], %s1605_s18, %s1605_s18, %s1606_s19  }
  0x29   :  { %s1607_s22 = smov [#allocation8]  }
  0x2a   :  { %s61_s23 = sshll.u32 %s1607_s22, 4  ;;  %s62_s23 = int_to_ptr.vmem [resolvable:$true] %s61_s23 }
  0x2b   :  { %s1558_s0 = scalar_lea.vmem %s62_s23, 1024  ;;  %p1563_p2 = scmp.lt.s32.totalorder %s62_s23, %s62_s23 }
  0x2c   :  { %p1559_p1 = scmp.ne.s32.totalorder %s62_s23, %s1558_s0  ;;  %p1564_p3 = scmp.lt.s32.totalorder %s1558_s0, %s1558_s0 }
  0x2e   :  { %p1565_p4 = por %p1564_p3, %p1563_p2 }
  0x30   :  { %p1566_p5 = pnand %p1565_p4, %p1559_p1 }
  0x32   :  { %1569 = shalt.err (!%p1566_p5)
}
  0x33   :  { %67 = dma.hbm_to_vmem [thread:$0]  %s1695_s5, 1024, %s62_s23, [#allocation9], %s1605_s18, %s1605_s18, %s1606_s19  }
  0x34   :  { %1590 = dma.done.wait [#allocation3], 1536  }
  0x35   :  { %1591 = vsyncadd [#allocation3], 4294965760 }
  0x36   :  { %1592 = dma.done.wait [#allocation6], 14336  }
  0x37   :  { %1593 = vsyncadd [#allocation6], 4294952960 }
  0x38   :  { %1594 = dma.done.wait [#allocation9], 1024  }
  0x39   :  { %1595 = vsyncadd [#allocation9], 4294966272  ;;  %v1322_v0 = vld [vmem:[#allocation5 + $0x74] ss:$8 sps:$4 sm:$0xff]   ;;  %v1324_v1 = vld [vmem:[#allocation5 + $0x70] ss:$8 sps:$4 sm:$0xff]  }
  0x3a   :  { %689 = vmatprep.subr.bf16.mxu0 %v1322_v0  ;;  %v1325_v2 = vld [vmem:[#allocation5 + $0x174] ss:$8 sps:$4 sm:$0xff]   ;;  %v1327_v3 = vld [vmem:[#allocation5 + $0x170] ss:$8 sps:$4 sm:$0xff]   ;;  %v1328_v4 = vld [vmem:[#allocation5 + $0x64] ss:$8 sps:$4 sm:$0xff]  }
  0x3b   :  { %690 = vmatpush1.bf16.msra.mxu0 %v1324_v1  ;;  %v1330_v5 = vld [vmem:[#allocation5 + $0x60] ss:$8 sps:$4 sm:$0xff]   ;;  %732 = vmatprep.subr.bf16.mxu1 %v1325_v2  ;;  %v1331_v6 = vld [vmem:[#allocation5 + $0x164] ss:$8 sps:$4 sm:$0xff]   ;;  %v1334_v8 = vld [vmem:[#allocation5 + $0x54] ss:$8 sps:$4 sm:$0xff]  }
  0x3c   :  { %733 = vmatpush1.bf16.msra.mxu1 %v1327_v3  ;;  %691 = vmatprep.subr.bf16.mxu0 %v1328_v4  ;;  %v1333_v7 = vld [vmem:[#allocation5 + $0x160] ss:$8 sps:$4 sm:$0xff]   ;;  %v1336_v9 = vld [vmem:[#allocation5 + $0x50] ss:$8 sps:$4 sm:$0xff]   ;;  %v1337_v10 = vld [vmem:[#allocation5 + $0x154] ss:$8 sps:$4 sm:$0xff]  }
  0x3d   :  { %734 = vmatprep.subr.bf16.mxu1 %v1331_v6  ;;  %v1340_v11 = vld [vmem:[#allocation5 + $0x44] ss:$8 sps:$4 sm:$0xff]   ;;  %v1339_v12 = vld [vmem:[#allocation5 + $0x150] ss:$8 sps:$4 sm:$0xff]   ;;  %v1342_v14 = vld [vmem:[#allocation5 + $0x40] ss:$8 sps:$4 sm:$0xff]  }
  0x3e   :  { %v1343_v13 = vld [vmem:[#allocation5 + $0x144] ss:$8 sps:$4 sm:$0xff]   ;;  %v1346_v15 = vld [vmem:[#allocation5 + $0x34] ss:$8 sps:$4 sm:$0xff]   ;;  %v1345_v16 = vld [vmem:[#allocation5 + $0x140] ss:$8 sps:$4 sm:$0xff]  }
  0x3f   :  { %692 = vmatpush1.bf16.msra.mxu0 %v1330_v5  ;;  %v1349_v17 = vld [vmem:[#allocation5 + $0x134] ss:$8 sps:$4 sm:$0xff]   ;;  %v1348_v18 = vld [vmem:[#allocation5 + $0x30] ss:$8 sps:$4 sm:$0xff]   ;;  %v1352_v19 = vld [vmem:[#allocation5 + $0x24] ss:$8 sps:$4 sm:$0xff]  }
  0x40   :  { %693 = vmatprep.subr.bf16.mxu0 %v1334_v8  ;;  %735 = vmatpush1.bf16.msra.mxu1 %v1333_v7  ;;  %v1351_v20 = vld [vmem:[#allocation5 + $0x130] ss:$8 sps:$4 sm:$0xff]   ;;  %v1355_v21 = vld [vmem:[#allocation5 + $0x124] ss:$8 sps:$4 sm:$0xff]   ;;  %v1354_v22 = vld [vmem:[#allocation5 + $0x20] ss:$8 sps:$4 sm:$0xff]  }
  0x41   :  { %736 = vmatprep.subr.bf16.mxu1 %v1337_v10  ;;  %v1358_v23 = vld [vmem:[#allocation5 + $0x14] ss:$8 sps:$4 sm:$0xff]   ;;  %v1357_v24 = vld [vmem:[#allocation5 + $0x120] ss:$8 sps:$4 sm:$0xff]   ;;  %v1360_v26 = vld [vmem:[#allocation5 + $0x10] ss:$8 sps:$4 sm:$0xff]  }
  0x42   :  { %v1361_v25 = vld [vmem:[#allocation5 + $0x114] ss:$8 sps:$4 sm:$0xff]   ;;  %v1364_v27 = vld [vmem:[#allocation5 + $0x4] ss:$8 sps:$4 sm:$0xff]   ;;  %v1363_v28 = vld [vmem:[#allocation5 + $0x110] ss:$8 sps:$4 sm:$0xff]  }
  0x43   :  { %694 = vmatpush1.bf16.msra.mxu0 %v1336_v9  ;;  %v1367_v29 = vld [vmem:[#allocation5 + $0x104] ss:$8 sps:$4 sm:$0xff]   ;;  %v1366_v30 = vld [vmem:[#allocation5] ss:$8 sps:$4 sm:$0xff]   ;;  %v1370_v31 = vld [vmem:[#allocation5 + $0xf4] ss:$8 sps:$4 sm:$0xff]  }
  0x44   :  { %695 = vmatprep.subr.bf16.mxu0 %v1340_v11  ;;  %737 = vmatpush1.bf16.msra.mxu1 %v1339_v12  ;;  %v1369_v32 = vld [vmem:[#allocation5 + $0x100] ss:$8 sps:$4 sm:$0xff]   ;;  %v1373_v33 = vld [vmem:[#allocation5 + $0x1f4] ss:$8 sps:$4 sm:$0xff]   ;;  %v1372_v34 = vld [vmem:[#allocation5 + $0xf0] ss:$8 sps:$4 sm:$0xff]  }
  0x45   :  { %738 = vmatprep.subr.bf16.mxu1 %v1343_v13  ;;  %v1376_v35 = vld [vmem:[#allocation5 + $0xe4] ss:$8 sps:$4 sm:$0xff]   ;;  %v1375_v36 = vld [vmem:[#allocation5 + $0x1f0] ss:$8 sps:$4 sm:$0xff]   ;;  %v1378_v38 = vld [vmem:[#allocation5 + $0xe0] ss:$8 sps:$4 sm:$0xff]  }
  0x46   :  { %v1379_v37 = vld [vmem:[#allocation5 + $0x1e4] ss:$8 sps:$4 sm:$0xff]   ;;  %v1382_v39 = vld [vmem:[#allocation5 + $0xd4] ss:$8 sps:$4 sm:$0xff]   ;;  %v1381_v40 = vld [vmem:[#allocation5 + $0x1e0] ss:$8 sps:$4 sm:$0xff]  }
  0x47   :  { %696 = vmatpush1.bf16.msra.mxu0 %v1342_v14  ;;  %v1385_v41 = vld [vmem:[#allocation5 + $0x1d4] ss:$8 sps:$4 sm:$0xff]   ;;  %v1384_v42 = vld [vmem:[#allocation5 + $0xd0] ss:$8 sps:$4 sm:$0xff]   ;;  %v1388_v43 = vld [vmem:[#allocation5 + $0xc4] ss:$8 sps:$4 sm:$0xff]  }
  0x48   :  { %697 = vmatprep.subr.bf16.mxu0 %v1346_v15  ;;  %739 = vmatpush1.bf16.msra.mxu1 %v1345_v16  ;;  %v1387_v44 = vld [vmem:[#allocation5 + $0x1d0] ss:$8 sps:$4 sm:$0xff]   ;;  %v1391_v45 = vld [vmem:[#allocation5 + $0x1c4] ss:$8 sps:$4 sm:$0xff]   ;;  %v1390_v48 = vld [vmem:[#allocation5 + $0xc0] ss:$8 sps:$4 sm:$0xff]  }
  0x49   :  { %740 = vmatprep.subr.bf16.mxu1 %v1349_v17  ;;  %v84_v46 = vld [vmem:[#allocation2 + $0x8] sm:$0xff]  ;;  %v90_v47 = vld [vmem:[#allocation2 + $0x38] sm:$0xff]  ;;  %v83_v5 = vld [vmem:[#allocation2] sm:$0xff]  ;;  %vm1609_vm0 = vmmov 0  }
  0x4a   :  { %v96_v49 = vpack.c.bf16 %v90_v47, %v84_v46  ;;  %v1394_v50 = vld [vmem:[#allocation5 + $0xb4] ss:$8 sps:$4 sm:$0xff]   ;;  %v1393_v51 = vld [vmem:[#allocation5 + $0x1c0] ss:$8 sps:$4 sm:$0xff]   ;;  %v1396_v56 = vld [vmem:[#allocation5 + $0xb0] ss:$8 sps:$4 sm:$0xff]  }
  0x4b   :  { %698 = vmatpush1.bf16.msra.mxu0 %v1348_v18  ;;  %v86_v52 = vld [vmem:[#allocation2 + $0x18] sm:$0xff]  ;;  %v92_v53 = vld [vmem:[#allocation2 + $0x48] sm:$0xff]  ;;  %v89_v7 = vld [vmem:[#allocation2 + $0x30] sm:$0xff] }
  0x4c   :  { %699 = vmatprep.subr.bf16.mxu0 %v1352_v19  ;;  %741 = vmatpush1.bf16.msra.mxu1 %v1351_v20  ;;  %v1397_v54 = vld [vmem:[#allocation5 + $0x1b4] ss:$8 sps:$4 sm:$0xff]   ;;  %v98_v55 = vpack.c.bf16 %v92_v53, %v86_v52  ;;  %v1400_v57 = vld [vmem:[#allocation5 + $0xa4] ss:$8 sps:$4 sm:$0xff]   ;;  %v1399_v58 = vld [vmem:[#allocation5 + $0x1b0] ss:$8 sps:$4 sm:$0xff]   ;;  %v95_v11 = vpack.c.bf16 %v89_v7, %v83_v5 }
  0x4d   :  { %742 = vmatprep.subr.bf16.mxu1 %v1355_v21  ;;  %721 = vmatprep.mubr.bf16.mxu0 %v96_v49  ;;  %v1403_v59 = vld [vmem:[#allocation5 + $0x1a4] ss:$8 sps:$4 sm:$0xff]   ;;  %v1402_v60 = vld [vmem:[#allocation5 + $0xa0] ss:$8 sps:$4 sm:$0xff]   ;;  %v1406_v61 = vld [vmem:[#allocation5 + $0x94] ss:$8 sps:$4 sm:$0xff]  }
  0x4e   :  { %764 = vmatprep.mubr.bf16.mxu1 %v98_v55  ;;  %v1405_v62 = vld [vmem:[#allocation5 + $0x1a0] ss:$8 sps:$4 sm:$0xff]   ;;  %v1409_v63 = vld [vmem:[#allocation5 + $0x194] ss:$8 sps:$4 sm:$0xff]   ;;  %v1408_v0 = vld [vmem:[#allocation5 + $0x90] ss:$8 sps:$4 sm:$0xff]  }
  0x4f   :  { %700 = vmatpush1.bf16.msra.mxu0 %v1354_v22  ;;  %v1411_v1 = vld [vmem:[#allocation5 + $0x190] ss:$8 sps:$4 sm:$0xff]   ;;  %v1412_v2 = vld [vmem:[#allocation5 + $0x84] ss:$8 sps:$4 sm:$0xff]   ;;  %v1414_v3 = vld [vmem:[#allocation5 + $0x80] ss:$8 sps:$4 sm:$0xff]  }
  0x50   :  { %701 = vmatprep.subr.bf16.mxu0 %v1358_v23  ;;  %743 = vmatpush1.bf16.msra.mxu1 %v1357_v24  ;;  %v1415_v4 = vld [vmem:[#allocation5 + $0x184] ss:$8 sps:$4 sm:$0xff]   ;;  %v1417_v6 = vld [vmem:[#allocation5 + $0x180] ss:$8 sps:$4 sm:$0xff]   ;;  %v1420_v8 = vld [vmem:[#allocation5 + $0x274] ss:$8 sps:$4 sm:$0xff]  }
  0x51   :  { %744 = vmatprep.subr.bf16.mxu1 %v1361_v25  ;;  %v85_v9 = vld [vmem:[#allocation2 + $0x10] sm:$0xff]  ;;  %v91_v10 = vld [vmem:[#allocation2 + $0x40] sm:$0xff]  ;;  %v88_v15 = vld [vmem:[#allocation2 + $0x28] sm:$0xff] }
  0x52   :  { %v1418_v12 = vld [vmem:[#allocation5 + $0x270] ss:$8 sps:$4 sm:$0xff]   ;;  %v97_v13 = vpack.c.bf16 %v91_v10, %v85_v9  ;;  %v1423_v14 = vld [vmem:[#allocation5 + $0x264] ss:$8 sps:$4 sm:$0xff]   ;;  %v1421_v16 = vld [vmem:[#allocation5 + $0x260] ss:$8 sps:$4 sm:$0xff]  }
  0x53   :  { %702 = vmatpush1.bf16.msra.mxu0 %v1360_v26  ;;  %v94_v17 = vld [vmem:[#allocation2 + $0x58] sm:$0xff]  ;;  %v1429_v21 = vld [vmem:[#allocation5 + $0x244] ss:$8 sps:$4 sm:$0xff]   ;;  %v1427_v22 = vld [vmem:[#allocation5 + $0x240] ss:$8 sps:$4 sm:$0xff]  }
  0x54   :  { %703 = vmatprep.subr.bf16.mxu0 %v1364_v27  ;;  %745 = vmatpush1.bf16.msra.mxu1 %v1363_v28  ;;  %v1426_v18 = vld [vmem:[#allocation5 + $0x254] ss:$8 sps:$4 sm:$0xff]   ;;  %v100_v19 = vpack.c.bf16 %v94_v17, %v88_v15  ;;  %v1424_v20 = vld [vmem:[#allocation5 + $0x250] ss:$8 sps:$4 sm:$0xff]   ;;  %v1435_v25 = vld [vmem:[#allocation5 + $0x224] ss:$8 sps:$4 sm:$0xff]  }
  0x55   :  { %746 = vmatprep.subr.bf16.mxu1 %v1367_v29  ;;  %v1432_v23 = vld [vmem:[#allocation5 + $0x234] ss:$8 sps:$4 sm:$0xff]   ;;  %v1430_v24 = vld [vmem:[#allocation5 + $0x230] ss:$8 sps:$4 sm:$0xff]   ;;  %v1433_v26 = vld [vmem:[#allocation5 + $0x220] ss:$8 sps:$4 sm:$0xff]  }
  0x56   :  { %v1438_v27 = vld [vmem:[#allocation5 + $0x214] ss:$8 sps:$4 sm:$0xff]   ;;  %v1436_v28 = vld [vmem:[#allocation5 + $0x210] ss:$8 sps:$4 sm:$0xff]   ;;  %v1441_v29 = vld [vmem:[#allocation5 + $0x204] ss:$8 sps:$4 sm:$0xff]  }
  0x57   :  { %704 = vmatpush1.bf16.msra.mxu0 %v1366_v30  ;;  %v1439_v30 = vld [vmem:[#allocation5 + $0x200] ss:$8 sps:$4 sm:$0xff]   ;;  %v1468_v52 = vld [vmem:[#allocation7 + $0x70] sm:$0xff]  }
  0x58   :  { %705 = vmatprep.subr.bf16.mxu0 %v1370_v31  ;;  %747 = vmatpush1.bf16.msra.mxu1 %v1369_v32  ;;  %v1444_v31 = vld [vmem:[#allocation5 + $0x2f4] ss:$8 sps:$4 sm:$0xff]   ;;  %v1442_v32 = vld [vmem:[#allocation5 + $0x2f0] ss:$8 sps:$4 sm:$0xff]   ;;  %v1463_v46 = vld [vmem:[#allocation5 + $0x280] ss:$8 sps:$4 sm:$0xff]  }
  0x59   :  { %748 = vmatprep.subr.bf16.mxu1 %v1373_v33  ;;  %v1447_v33 = vld [vmem:[#allocation5 + $0x2e4] ss:$8 sps:$4 sm:$0xff]   ;;  %v1469_v53 = vld [vmem:[#allocation7 + $0x30] sm:$0xff]   ;;  %v197_v9 = vld [vmem:[%s1692_s2] sm:$0x3] }
  0x5a   :  { %v87_v47 = vld [vmem:[#allocation2 + $0x20] sm:$0xff]  ;;  %v1471_v55 = vld [vmem:[#allocation7 + $0x28] sm:$0xff]  }
  0x5b   :  { %706 = vmatpush2.bf16.msra.mxu0 %v1372_v34  ;;  %v1445_v34 = vld [vmem:[#allocation5 + $0x2e0] ss:$8 sps:$4 sm:$0xff]  }
  0x5c   :  { %707 = vmatprep.subr.bf16.mxu0 %v1376_v35  ;;  %749 = vmatpush2.bf16.msra.mxu1 %v1375_v36  ;;  %v1450_v35 = vld [vmem:[#allocation5 + $0x2d4] ss:$8 sps:$4 sm:$0xff]   ;;  %v1448_v36 = vld [vmem:[#allocation5 + $0x2d0] ss:$8 sps:$4 sm:$0xff]  }
  0x5d   :  { %750 = vmatprep.subr.bf16.mxu1 %v1379_v37  ;;  %v1453_v37 = vld [vmem:[#allocation5 + $0x2c4] ss:$8 sps:$4 sm:$0xff]  }
  0x5f   :  { %708 = vmatpush2.bf16.msra.mxu0 %v1378_v38  ;;  %v1451_v38 = vld [vmem:[#allocation5 + $0x2c0] ss:$8 sps:$4 sm:$0xff]  }
  0x60   :  { %709 = vmatprep.subr.bf16.mxu0 %v1382_v39  ;;  %751 = vmatpush2.bf16.msra.mxu1 %v1381_v40  ;;  %v1456_v39 = vld [vmem:[#allocation5 + $0x2b4] ss:$8 sps:$4 sm:$0xff]   ;;  %v1454_v40 = vld [vmem:[#allocation5 + $0x2b0] ss:$8 sps:$4 sm:$0xff]  }
  0x61   :  { %752 = vmatprep.subr.bf16.mxu1 %v1385_v41  ;;  %v1459_v41 = vld [vmem:[#allocation5 + $0x2a4] ss:$8 sps:$4 sm:$0xff]  }
  0x63   :  { %710 = vmatpush2.bf16.msra.mxu0 %v1384_v42  ;;  %v1457_v42 = vld [vmem:[#allocation5 + $0x2a0] ss:$8 sps:$4 sm:$0xff]  }
  0x64   :  { %711 = vmatprep.subr.bf16.mxu0 %v1388_v43  ;;  %753 = vmatpush2.bf16.msra.mxu1 %v1387_v44  ;;  %v1462_v43 = vld [vmem:[#allocation5 + $0x294] ss:$8 sps:$4 sm:$0xff]   ;;  %v1460_v44 = vld [vmem:[#allocation5 + $0x290] ss:$8 sps:$4 sm:$0xff]  }
  0x65   :  { %754 = vmatprep.subr.bf16.mxu1 %v1391_v45  ;;  %v1465_v45 = vld [vmem:[#allocation5 + $0x284] ss:$8 sps:$4 sm:$0xff]  }
  0x67   :  { %712 = vmatpush2.bf16.msra.mxu0 %v1390_v48  ;;  %v93_v48 = vld [vmem:[#allocation2 + $0x50] sm:$0xff] }
  0x68   :  { %713 = vmatprep.subr.bf16.mxu0 %v1394_v50  ;;  %755 = vmatpush2.bf16.msra.mxu1 %v1393_v51  ;;  %v99_v49 = vpack.c.bf16 %v93_v48, %v87_v47  ;;  %v1466_v50 = vld [vmem:[#allocation7 + $0x78] sm:$0xff]   ;;  %v1489_v47 = vld [vmem:[#allocation8] sm:$0xff]  }
  0x69   :  { %756 = vmatprep.subr.bf16.mxu1 %v1397_v54  ;;  %v1467_v51 = vld [vmem:[#allocation7 + $0x38] sm:$0xff]   ;;  %v1470_v54 = vld [vmem:[#allocation7 + $0x68] sm:$0xff]  }
  0x6b   :  { %714 = vmatpush2.bf16.msra.mxu0 %v1396_v56  ;;  %v1472_v56 = vld [vmem:[#allocation7 + $0x60] sm:$0xff]  }
  0x6c   :  { %715 = vmatprep.subr.bf16.mxu0 %v1400_v57  ;;  %757 = vmatpush2.bf16.msra.mxu1 %v1399_v58  ;;  %v1473_v57 = vld [vmem:[#allocation7 + $0x20] sm:$0xff]   ;;  %v1474_v58 = vld [vmem:[#allocation7 + $0x58] sm:$0xff]  }
  0x6d   :  { %758 = vmatprep.subr.bf16.mxu1 %v1403_v59  ;;  %v1475_v59 = vld [vmem:[#allocation7 + $0x18] sm:$0xff]  }
  0x6f   :  { %716 = vmatpush2.bf16.msra.mxu0 %v1402_v60  ;;  %v1476_v60 = vld [vmem:[#allocation7 + $0x50] sm:$0xff]  }
  0x70   :  { %717 = vmatprep.subr.bf16.mxu0 %v1406_v61  ;;  %759 = vmatpush2.bf16.msra.mxu1 %v1405_v62  ;;  %v1477_v61 = vld [vmem:[#allocation7 + $0x10] sm:$0xff]   ;;  %v1478_v62 = vld [vmem:[#allocation7 + $0x48] sm:$0xff]  }
  0x71   :  { %760 = vmatprep.subr.bf16.mxu1 %v1409_v63  ;;  %v1479_v63 = vld [vmem:[#allocation7 + $0x8] sm:$0xff]  }
  0x73   :  { %718 = vmatpush2.bf16.msra.mxu0 %v1408_v0  ;;  %v1480_v0 = vld [vmem:[#allocation7 + $0x40] sm:$0xff]  }
  0x74   :  { %719 = vmatprep.subr.bf16.mxu0 %v1412_v2  ;;  %761 = vmatpush2.bf16.msra.mxu1 %v1411_v1  ;;  %v1481_v1 = vld [vmem:[#allocation7] sm:$0xff]   ;;  %v1608_v2 = vmov 0.0  }
  0x75   :  { %762 = vmatprep.subr.bf16.mxu1 %v1415_v4 }
  0x77   :  { %720 = vmatpush2.bf16.msra.mxu0 %v1414_v3  ;;  %v199_v3 = vlaneseq }
  0x78   :  { %775 = vmatprep.subr.bf16.mxu0 %v1420_v8  ;;  %763 = vmatpush2.bf16.msra.mxu1 %v1417_v6 }
  0x79   :  { %1258 = vmatprep.subr.bf16.mxu1 %v1466_v50  ;;  %v200_v5 = vshrl.u32 %v199_v3, 7 }
  0x7a   :  { %722 = vmatmul.mubr.bf16.vlgmr.msra.gmra.mxu0 %v95_v11 }
  0x7b   :  { %776 = vmatpush1.bf16.msra.mxu0 %v1418_v12  ;;  %765 = vmatmul.mubr.bf16.vlgmr.msra.gmra.mxu1 %v97_v13  ;;  %v205_v8 = vsub.s32 1, %v200_v5  ;;  %v201_v10 = vsub.s32 0, %v200_v5 }
  0x7c   :  { %777 = vmatprep.subr.bf16.mxu0 %v1423_v14  ;;  %807 = vmatprep.mubr.bf16.mxu0 %v100_v19 }
  0x7d   :  { %1259 = vmatpush3.bf16.msra.mxu1 %v1467_v51  ;;  %v206_v13 = vrot.slane %v197_v9, %v205_v8  ;;  %v202_v14 = vrot.slane %v197_v9, %v201_v10  ;;  %v1232_v51 = vld [vmem:[%s1694_s4] ss:$0 sm:$0xff] }
  0x7e   :  { %1260 = vmatprep.subr.bf16.mxu1 %v1468_v52 }
  0x7f   :  { %778 = vmatpush1.bf16.msra.mxu0 %v1421_v16 }
  0x80   :  { %779 = vmatprep.subr.bf16.mxu0 %v1426_v18 }
  0x81   :  { %1261 = vmatpush3.bf16.msra.mxu1 %v1469_v53 }
  0x82   :  { %1262 = vmatprep.subr.bf16.mxu1 %v1470_v54 }
  0x83   :  { %780 = vmatpush1.bf16.msra.mxu0 %v1424_v20 }
  0x84   :  { %781 = vmatprep.subr.bf16.mxu0 %v1429_v21 }
  0x85   :  { %1263 = vmatpush3.bf16.msra.mxu1 %v1471_v55 }
  0x86   :  { %1264 = vmatprep.subr.bf16.mxu1 %v1472_v56 }
  0x87   :  { %782 = vmatpush1.bf16.msra.mxu0 %v1427_v22 }
  0x88   :  { %783 = vmatprep.subr.bf16.mxu0 %v1432_v23 }
  0x89   :  { %1265 = vmatpush3.bf16.msra.mxu1 %v1473_v57 }
  0x8a   :  { %1266 = vmatprep.subr.bf16.mxu1 %v1474_v58 }
  0x8b   :  { %784 = vmatpush1.bf16.msra.mxu0 %v1430_v24 }
  0x8c   :  { %785 = vmatprep.subr.bf16.mxu0 %v1435_v25 }
  0x8d   :  { %1267 = vmatpush3.bf16.msra.mxu1 %v1475_v59 }
  0x8e   :  { %1268 = vmatprep.subr.bf16.mxu1 %v1476_v60  ;;  %v1249_v60 = vld [vmem:[%s1696_s6] ss:$0 sm:$0xff] }
  0x8f   :  { %786 = vmatpush1.bf16.msra.mxu0 %v1433_v26 }
  0x90   :  { %787 = vmatprep.subr.bf16.mxu0 %v1438_v27 }
  0x91   :  { %1269 = vmatpush3.bf16.msra.mxu1 %v1477_v61 }
  0x92   :  { %1270 = vmatprep.subr.bf16.mxu1 %v1478_v62 }
  0x93   :  { %788 = vmatpush1.bf16.msra.mxu0 %v1436_v28 }
  0x94   :  { %789 = vmatprep.subr.bf16.mxu0 %v1441_v29 }
  0x95   :  { %1271 = vmatpush3.bf16.msra.mxu1 %v1479_v63 }
  0x96   :  { %1272 = vmatprep.subr.bf16.mxu1 %v1480_v0 }
  0x97   :  { %790 = vmatpush1.bf16.msra.mxu0 %v1439_v30 }
  0x98   :  { %791 = vmatprep.subr.bf16.mxu0 %v1444_v31 }
  0x99   :  { %1273 = vmatpush3.bf16.msra.mxu1 %v1481_v1 }
  0x9a   :  { %1289 = vmatprep.subr.bf16.mxu1 %v1608_v2 }
  0x9b   :  { %792 = vmatpush2.bf16.msra.mxu0 %v1442_v32 }
  0x9c   :  { %793 = vmatprep.subr.bf16.mxu0 %v1447_v33 }
  0x9f   :  { %794 = vmatpush2.bf16.msra.mxu0 %v1445_v34 }
  0xa0   :  { %795 = vmatprep.subr.bf16.mxu0 %v1450_v35 }
  0xa3   :  { %796 = vmatpush2.bf16.msra.mxu0 %v1448_v36 }
  0xa4   :  { %797 = vmatprep.subr.bf16.mxu0 %v1453_v37 }
  0xa7   :  { %798 = vmatpush2.bf16.msra.mxu0 %v1451_v38 }
  0xa8   :  { %799 = vmatprep.subr.bf16.mxu0 %v1456_v39  ;;  %v1482_v39 = vld [vmem:[#allocation8 + $0x38] sm:$0xff]  }
  0xab   :  { %800 = vmatpush2.bf16.msra.mxu0 %v1454_v40 }
  0xac   :  { %801 = vmatprep.subr.bf16.mxu0 %v1459_v41  ;;  %v1483_v41 = vld [vmem:[#allocation8 + $0x30] sm:$0xff]  }
  0xaf   :  { %802 = vmatpush2.bf16.msra.mxu0 %v1457_v42  ;;  %v1484_v42 = vld [vmem:[#allocation8 + $0x28] sm:$0xff]  }
  0xb0   :  { %803 = vmatprep.subr.bf16.mxu0 %v1462_v43  ;;  %v1485_v43 = vld [vmem:[#allocation8 + $0x20] sm:$0xff]  }
  0xb3   :  { %804 = vmatpush2.bf16.msra.mxu0 %v1460_v44  ;;  %v1486_v44 = vld [vmem:[#allocation8 + $0x18] sm:$0xff]  }
  0xb4   :  { %805 = vmatprep.subr.bf16.mxu0 %v1465_v45  ;;  %v1487_v45 = vld [vmem:[#allocation8 + $0x10] sm:$0xff]  }
  0xb7   :  { %806 = vmatpush2.bf16.msra.mxu0 %v1463_v46  ;;  %v1488_v46 = vld [vmem:[#allocation8 + $0x8] sm:$0xff]  }
  0xba   :  { %808 = vmatmul.mubr.bf16.vlgmr.msra.gmra.mxu0 %v99_v49 }
 0x13a   :  { %v723_v4 = vpop.f32.mrf.mxu0 }
 0x13b   :  { %v766_v7 = vpop.f32.mrf.mxu1  ;;  %v724_v19 = vadd.f32 %v723_v4, %v202_v14 }
 0x13c   :  { %v725_v6 = vpop.f32.mrf.mxu0 }
 0x13d   :  { %v768_v12 = vpop.f32.mrf.mxu1  ;;  %v726_v17 = vadd.f32 %v725_v6, %v206_v13  ;;  %v767_v26 = vadd.f32 %v766_v7, %v724_v19 }
 0x13e   :  { %v727_v11 = vpop.f32.mrf.mxu0 }
 0x13f   :  { %v770_v16 = vpop.f32.mrf.mxu1  ;;  %v728_v18 = vadd.f32 %v727_v11, %v202_v14  ;;  %v769_v24 = vadd.f32 %v768_v12, %v726_v17 }
 0x140   :  { %v729_v15 = vpop.f32.mrf.mxu0 }
 0x141   :  { %v730_v21 = vadd.f32 %v729_v15, %v206_v13  ;;  %v772_v22 = vpop.f32.mrf.mxu1  ;;  %v771_v25 = vadd.f32 %v770_v16, %v728_v18 }
 0x143   :  { %v773_v28 = vadd.f32 %v772_v22, %v730_v21 }
 0x17a   :  { %v809_v20 = vpop.f32.mrf.mxu0 }
 0x17b   :  { %v810_v31 = vadd.f32 %v809_v20, %v767_v26 }
 0x17c   :  { %v811_v23 = vpop.f32.mrf.mxu0 }
 0x17d   :  { %v812_v29 = vadd.f32 %v811_v23, %v769_v24  ;;  %v818_v37 = vmax.f32 %v810_v31, 0.0 }
 0x17e   :  { %v813_v27 = vpop.f32.mrf.mxu0 }
 0x17f   :  { %v814_v30 = vadd.f32 %v813_v27, %v771_v25  ;;  %v819_v35 = vmax.f32 %v812_v29, 0.0 }
 0x180   :  { %v815_v32 = vpop.f32.mrf.mxu0 }
 0x181   :  { %v816_v33 = vadd.f32 %v815_v32, %v773_v28  ;;  %v820_v34 = vmax.f32 %v814_v30, 0.0 }
 0x183   :  { %v821_v36 = vmax.f32 %v816_v33, 0.0  ;;  %v822_v40 = vpack.c.bf16 %v820_v34, %v818_v37 }
 0x185   :  { %v823_v38 = vpack.c.bf16 %v821_v36, %v819_v35 }
 0x187   :  { %991 = vmatprep.mubr.bf16.mxu1 %v823_v38 }
 0x188   :  { %992 = vmatmul.mubr.bf16.vlgmr.msra.gmra.mxu1 %v822_v40 }
 0x189   :  { %1290 = vmatpush3.bf16.msra.mxu1 %v1482_v39  ;;  %1305 = vmatprep.mubr.msk.bf16.mxu1 %vm1609_vm0, %v1608_v2 }
 0x18a   :  { %1291 = vmatprep.subr.bf16.mxu1 %v1608_v2 }
 0x18d   :  { %1292 = vmatpush3.bf16.msra.mxu1 %v1483_v41 }
 0x18e   :  { %1293 = vmatprep.subr.bf16.mxu1 %v1608_v2 }
 0x191   :  { %1294 = vmatpush3.bf16.msra.mxu1 %v1484_v42 }
 0x192   :  { %1295 = vmatprep.subr.bf16.mxu1 %v1608_v2 }
 0x195   :  { %1296 = vmatpush3.bf16.msra.mxu1 %v1485_v43 }
 0x196   :  { %1297 = vmatprep.subr.bf16.mxu1 %v1608_v2 }
 0x199   :  { %1298 = vmatpush3.bf16.msra.mxu1 %v1486_v44 }
 0x19a   :  { %1299 = vmatprep.subr.bf16.mxu1 %v1608_v2 }
 0x19d   :  { %1300 = vmatpush3.bf16.msra.mxu1 %v1487_v45 }
 0x19e   :  { %1301 = vmatprep.subr.bf16.mxu1 %v1608_v2 }
 0x1a1   :  { %1302 = vmatpush3.bf16.msra.mxu1 %v1488_v46 }
 0x1a2   :  { %1303 = vmatprep.subr.bf16.mxu1 %v1608_v2 }
 0x1a5   :  { %1304 = vmatpush3.bf16.msra.mxu1 %v1489_v47 }
 0x248   :  { %v1274_v48 = vpop.f32.mrf.mxu1 }
 0x24a   :  { %v1275_v49 = vpop.f32.mrf.mxu1 }
 0x24b   :  { %v1276_v50 = vadd.f32 %v1275_v49, %v1274_v48 }
 0x24c   :  { %v1277_v52 = vpop.f32.mrf.mxu1 }
 0x24d   :  { %v994_v54 = vadd.f32 %v1276_v50, %v1232_v51 }
 0x24e   :  { %v1278_v53 = vpop.f32.mrf.mxu1 }
 0x24f   :  { %v1279_v55 = vadd.f32 %v1278_v53, %v1277_v52  ;;  %v1000_v57 = vmax.f32 %v994_v54, 0.0 }
 0x251   :  { %v997_v56 = vadd.f32 %v1279_v55, %v1232_v51 }
 0x253   :  { %v1001_v58 = vmax.f32 %v997_v56, 0.0 }
 0x255   :  { %v1002_v59 = vpack.c.bf16 %v1001_v58, %v1000_v57 }
 0x257   :  { %1306 = vmatmul.mubr.bf16.vlgmr.msra.gmra.mxu1 %v1002_v59 }
 0x317   :  { %v1108_v61 = vpop.f32.mrf.mxu1 }
 0x318   :  { %v1109_v62 = vadd.f32 %v1249_v60, %v1108_v61 }
 0x319   :  { %v1307_v63 = vpop.f32.mrf.mxu1 }
 0x31a   :  { %1115 = vst [vmem:[#allocation10] sm:$0xff] %v1109_v62 }
 0x31b   :  { %v1111_v0 = vpop.f32.mrf.mxu1 }
 0x31c   :  { %v1112_v1 = vadd.f32 %v1249_v60, %v1111_v0 }
 0x31d   :  { %v1308_v2 = vpop.f32.mrf.mxu1 }
 0x31e   :  { %1116 = vst [vmem:[#allocation10 + $0x8] sm:$0xff] %v1112_v1 }
 0x31f   :  { %1121 = vsyncadd [#allocation4], 128  ;;  %s1610_s4 = smov [#allocation10]  }
 0x320   :  { %s1122_s8 = sshll.u32 %s1610_s4, 4  ;;  %s1123_s8 = int_to_ptr.vmem [resolvable:$true] %s1122_s8 }
 0x321   :  { %s1570_s9 = scalar_lea.vmem %s1123_s8, 128  ;;  %s1574_s10 = scalar_lea.vmem %s1123_s8, 256 }
 0x322   :  { %p1571_p6 = scmp.ne.s32.totalorder %s1123_s8, %s1570_s9  ;;  %p1575_p7 = scmp.lt.s32.totalorder %s1123_s8, %s1123_s8 }
 0x323   :  { %p1576_p8 = scmp.lt.s32.totalorder %s1574_s10, %s1570_s9 }
 0x325   :  { %p1577_p9 = por %p1576_p8, %p1575_p7 }
 0x327   :  { %p1578_p10 = pnand %p1577_p9, %p1571_p6 }
 0x329   :  { %1581 = shalt.err (!%p1578_p10)
}
 0x32a   :  { %1128 = dma.vmem_to_hbm [thread:$0]  %s1123_s8, 128, %s1697_s7, [#allocation4], %s1599_s27, %s1599_s27, %s1600_s28  }
 0x32b   :  { %1596 = dma.done.wait [#allocation4], 256  }
 0x32c   :  { %1597 = vsyncadd [#allocation4], 4294967040 }
 0x32d   :  { %1132 = vsyncpa [#allocation3], 1 }
 0x32e   :  { %1133 = vsyncpa [#allocation6], 1 }
 0x32f   :  { %1134 = vsyncpa [#allocation9], 1 }
 0x330   :  { %1135 = vsyncpa [#allocation4], 1 }

</bundles_post_ra>
